<compile_context>
chip_gen: v6e
topology: v6e:2x2x1
jax: 0.10.0
libtpu: 0.0.40
codegen_flags: <defaults>
</compile_context>

<pallas_src>
import functools

import jax
import jax.numpy as jnp
from jax.experimental import pallas as pl
from jax.experimental.pallas import tpu as pltpu


def _add_coords_kernel(*refs, C, with_boundary):
    """One grid step == one (batch, spatial-tile) block.  Refs (lane-dense):
         in_ref    : (C, T)         input channels
         coords_ref: (n_coord, T)   xx, yy, (rr)  -- batch invariant, resident
         hm_ref    : (1, T)         last heatmap channel [only with_boundary]
         out_ref   : (C_out, T)
    """
    if with_boundary:
        in_ref, coords_ref, hm_ref, out_ref = refs
    else:
        in_ref, coords_ref, out_ref = refs

    # 1) passthrough of the input channels (pure streaming copy).
    out_ref[0:C, :] = in_ref[...]

    # 2) all extra channels written as one contiguous store.
    if with_boundary:
        xx = coords_ref[0:1, :]
        yy = coords_ref[1:2, :]
        boundary = jnp.clip(hm_ref[...].astype(jnp.float32), 0.0, 1.0)
        mask = boundary > 0.05
        zeros = jnp.zeros_like(xx)
        bx = jnp.where(mask, xx, zeros)
        by = jnp.where(mask, yy, zeros)
        out_ref[C:, :] = jnp.concatenate([coords_ref[...], bx, by], axis=0)
    else:
        out_ref[C:, :] = coords_ref[...]


def _choose_hw_tile(hw, row_bytes, budget=8 << 20):
    """Largest spatial tile that (a) equals the full extent or is a multiple of
    128 dividing hw, and (b) keeps the per-step block set under `budget` bytes
    (so double-buffered blocks fit the scoped-VMEM default on all gens)."""
    cap = max(128, (budget // max(row_bytes, 1)) // 128 * 128)
    if hw <= cap:
        return hw
    t = (min(cap, hw) // 128) * 128
    while t >= 128:
        if hw % t == 0:
            return t
        t -= 128
    return hw  # no aligned divisor found: fall back to one full-extent tile


def add_coords_th(input_tensor, heatmap=None, *, x_dim, y_dim,
                  with_r=False, with_boundary=False):
    """Pallas equivalent of AddCoordsTh.forward.  input_tensor: (B, C, H, W)."""
    B, C, H, W = input_tensor.shape
    assert H == x_dim and W == y_dim, "spatial dims must match (x_dim, y_dim)"

    dtype = input_tensor.dtype
    use_boundary = bool(with_boundary and heatmap is not None)
    n_coord = 3 if with_r else 2
    C_out = C + n_coord + (2 if use_boundary else 0)
    HW = H * W

    # ---- batch-invariant coordinate channels, computed ONCE (hoisted). ----
    # Guard against x_dim == 1 / y_dim == 1 (avoids division by zero).
    xd = max(x_dim - 1, 1)
    yd = max(y_dim - 1, 1)
    i = jnp.arange(H, dtype=jnp.float32)[:, None]
    j = jnp.arange(W, dtype=jnp.float32)[None, :]
    xx = jnp.broadcast_to(i / xd * 2.0 - 1.0, (H, W))   # xx[i, j] = norm(i)
    yy = jnp.broadcast_to(j / yd * 2.0 - 1.0, (H, W))   # yy[i, j] = norm(j)
    chans = [xx, yy]
    if with_r:
        # max(rr) over the whole tensor is exactly sqrt(2) (corners are +/-1),
        # so normalising by that constant matches the reference max-division.
        rr = jnp.sqrt(xx * xx + yy * yy) / jnp.sqrt(jnp.float32(2.0))
        chans.append(rr)
    coords = jnp.stack(chans, axis=0).reshape(n_coord, HW).astype(dtype)

    # ---- lane-dense views (contiguous reshapes, free in XLA). ----
    x_flat = input_tensor.reshape(B, C, HW)

    itemsize = jnp.dtype(dtype).itemsize
    row_bytes = (C + C_out + n_coord) * itemsize
    args = [x_flat, coords]
    if use_boundary:
        # Only the last heatmap channel is ever read; slice it out so the
        # kernel never moves the other heat_C - 1 channels HBM->VMEM.
        hm_last = heatmap[:, -1:, :, :].reshape(B, 1, HW)
        row_bytes += jnp.dtype(heatmap.dtype).itemsize
        args.append(hm_last)

    T = _choose_hw_tile(HW, row_bytes)
    n_t = HW // T

    in_specs = [
        pl.BlockSpec((None, C, T), lambda b, t: (b, 0, t)),
        # batch-invariant -> constant block index -> fetched once / resident
        pl.BlockSpec((n_coord, T), lambda b, t: (0, t)),
    ]
    if use_boundary:
        in_specs.append(pl.BlockSpec((None, 1, T), lambda b, t: (b, 0, t)))

    kernel = functools.partial(_add_coords_kernel, C=C,
                               with_boundary=use_boundary)

    out_flat = pl.pallas_call(
        kernel,
        out_shape=jax.ShapeDtypeStruct((B, C_out, HW), dtype),
        grid=(B, n_t),
        in_specs=in_specs,
        out_specs=pl.BlockSpec((None, C_out, T), lambda b, t: (b, 0, t)),
        compiler_params=pltpu.CompilerParams(
            dimension_semantics=("parallel", "parallel")),
    )(*args)
    return out_flat.reshape(B, C_out, H, W)


def _ref_add_coords(x, heatmap=None, with_r=False, with_boundary=False):
    """Pure-JAX reference mirroring the PyTorch forward."""
    B, C, H, W = x.shape
    i = jnp.arange(H, dtype=jnp.float32)[:, None]
    j = jnp.arange(W, dtype=jnp.float32)[None, :]
    xx = jnp.broadcast_to(i / (H - 1) * 2.0 - 1.0, (H, W))
    yy = jnp.broadcast_to(j / (W - 1) * 2.0 - 1.0, (H, W))
    xx_b = jnp.broadcast_to(xx[None, None], (B, 1, H, W))
    yy_b = jnp.broadcast_to(yy[None, None], (B, 1, H, W))
    ret = jnp.concatenate([x, xx_b, yy_b], axis=1)
    if with_r:
        rr = jnp.sqrt(xx_b ** 2 + yy_b ** 2)
        rr = rr / jnp.max(rr)
        ret = jnp.concatenate([ret, rr], axis=1)
    if with_boundary and heatmap is not None:
        boundary = jnp.clip(heatmap[:, -1:], 0.0, 1.0)
        xx_bd = jnp.where(boundary > 0.05, xx_b, jnp.zeros_like(xx_b))
        yy_bd = jnp.where(boundary > 0.05, yy_b, jnp.zeros_like(yy_b))
        ret = jnp.concatenate([ret, xx_bd, yy_bd], axis=1)
    return ret


if __name__ == "__main__":
    key = jax.random.PRNGKey(0)
    k1, k2 = jax.random.split(key)

    B, C, H, W = 2, 4, 16, 16          # small shapes; x_dim = H, y_dim = W
    x = jax.random.normal(k1, (B, C, H, W), dtype=jnp.float32)
    heatmap = jax.random.uniform(k2, (B, 3, H, W), dtype=jnp.float32)

    # default config (with_r=False, with_boundary=False)
    out0 = add_coords_th(x, x_dim=H, y_dim=W)
    jax.block_until_ready(out0)
    ref0 = _ref_add_coords(x)
    assert out0.shape == (B, C + 2, H, W)
    assert jnp.allclose(out0, ref0, atol=1e-6), "default config mismatch"

    # with_r=True
    out1 = add_coords_th(x, x_dim=H, y_dim=W, with_r=True)
    jax.block_until_ready(out1)
    ref1 = _ref_add_coords(x, with_r=True)
    assert out1.shape == (B, C + 3, H, W)
    assert jnp.allclose(out1, ref1, atol=1e-6), "with_r config mismatch"

    # with_boundary=True + heatmap
    out2 = add_coords_th(x, heatmap, x_dim=H, y_dim=W,
                         with_r=True, with_boundary=True)
    jax.block_until_ready(out2)
    ref2 = _ref_add_coords(x, heatmap, with_r=True, with_boundary=True)
    assert out2.shape == (B, C + 5, H, W)
    assert jnp.allclose(out2, ref2, atol=1e-6), "with_boundary config mismatch"

    print("KERNEL_OK")
</pallas_src>

<mosaic_0001>
module attributes {stable_mosaic.version = 11 : i64} {
  func.func @_add_coords_kernel(%arg0: i32, %arg1: i32, %arg2: memref<1x4x256xf32, #tpu.memory_space<vmem>>, %arg3: memref<2x256xf32, #tpu.memory_space<vmem>>, %arg4: memref<1x6x256xf32, #tpu.memory_space<vmem>>) attributes {dimension_semantics = [#tpu.dimension_semantics<parallel>, #tpu.dimension_semantics<parallel>], iteration_bounds = array<i64: 2, 1>, scalar_prefetch = 0 : i64, scratch_operands = 0 : i64, tpu.core_type = #tpu.core_type<tc>, window_params = [{transform_indices = @transform_0, window_bounds = array<i64: 1, 4, 256>}, {transform_indices = @transform_1, window_bounds = array<i64: 2, 256>}, {transform_indices = @transform_2, window_bounds = array<i64: 1, 6, 256>}]} {
    %c0 = arith.constant 0 : index
    %c0_0 = arith.constant 0 : index
    %c0_1 = arith.constant 0 : index
    %0 = vector.load %arg2[%c0, %c0_0, %c0_1] : memref<1x4x256xf32, #tpu.memory_space<vmem>>, vector<1x4x256xf32>
    %1 = vector.shape_cast %0 : vector<1x4x256xf32> to vector<4x256xf32>
    %c0_2 = arith.constant 0 : index
    %c0_3 = arith.constant 0 : index
    %c0_4 = arith.constant 0 : index
    %2 = vector.load %arg4[%c0_2, %c0_3, %c0_4] : memref<1x6x256xf32, #tpu.memory_space<vmem>>, vector<1x4x256xf32>
    %3 = vector.shape_cast %2 : vector<1x4x256xf32> to vector<4x256xf32>
    %4 = vector.shape_cast %1 : vector<4x256xf32> to vector<1x4x256xf32>
    tpu.vector_store %arg4[%c0_2, %c0_3, %c0_4], %4 {strides = array<i32>} : memref<1x6x256xf32, #tpu.memory_space<vmem>>, vector<1x4x256xf32>,
    %c0_5 = arith.constant 0 : index
    %c0_6 = arith.constant 0 : index
    %5 = vector.load %arg3[%c0_5, %c0_6] : memref<2x256xf32, #tpu.memory_space<vmem>>, vector<2x256xf32>
    %c0_7 = arith.constant 0 : index
    %c4 = arith.constant 4 : index
    %c0_8 = arith.constant 0 : index
    %6 = vector.load %arg4[%c0_7, %c4, %c0_8] : memref<1x6x256xf32, #tpu.memory_space<vmem>>, vector<1x2x256xf32>
    %7 = vector.shape_cast %6 : vector<1x2x256xf32> to vector<2x256xf32>
    %8 = vector.shape_cast %5 : vector<2x256xf32> to vector<1x2x256xf32>
    tpu.vector_store %arg4[%c0_7, %c4, %c0_8], %8 {strides = array<i32>} : memref<1x6x256xf32, #tpu.memory_space<vmem>>, vector<1x2x256xf32>,
    return
  }
  func.func @transform_0(%arg0: i32, %arg1: i32) -> (i32, i32, i32) {
    %c0_i32 = arith.constant 0 : i32
    %c0_i32_0 = arith.constant 0 : i32
    return %arg0, %c0_i32, %arg1 : i32, i32, i32
  }
  func.func @transform_1(%arg0: i32, %arg1: i32) -> (i32, i32) {
    %c0_i32 = arith.constant 0 : i32
    %c0_i32_0 = arith.constant 0 : i32
    return %c0_i32, %arg1 : i32, i32
  }
  func.func @transform_2(%arg0: i32, %arg1: i32) -> (i32, i32, i32) {
    %c0_i32 = arith.constant 0 : i32
    %c0_i32_0 = arith.constant 0 : i32
    return %arg0, %c0_i32, %arg1 : i32, i32, i32
  }
}

</mosaic_0001>

<bundles_post_ra>
// kernel: tpu_custom_call.1
= control target key start
LH: loop header
LB: loop body
LE: loop exit
PB: predicated region body
PF: predicated region fallthrough
CT: control target
= control target key end

     0   :  { %7 = vsyncpa [#allocation3], 0  ;;  %s672_s0 = inlined_call_operand.hbm [shape: f32[2,4,256], index: 0, kind: input, shape index: {}]   ;;  %s673_s1 = inlined_call_operand.hbm [shape: f32[2,256], index: 1, kind: input, shape index: {}]   ;;  %s674_s2 = inlined_call_operand.vmem [shape: f32[2,6,256], index: 2, kind: output, shape index: {}]  }
   0x1   :  { %9 = vsyncpa [#allocation3 + $0x1], 0 }
   0x2   :  { %10 = vsyncpa [#allocation5], 0  ;;  %s551_s9 = smov 0   ;;  %s553_s10 = smov 0  }
   0x3   :  { %s555_s11 = smov 0   ;;  %s557_s12 = smov 0  }
   0x4   :  { %s559_s13 = smov 0   ;;  %s561_s14 = smov 0  }
   0x5 LB: > { %s339_s15 = sadd.s32 4294967295, %s532_s14   ;;  %p50_p0 = scmp.ne.s32.totalorder %s516_s10, %s512_s9  ;;  %s532_s14 = sphi %s561_s14, %s16_s14   ;;  %s528_s13 = sphi %s559_s13, %s684_s13   ;;  %s524_s12 = sphi %s557_s12, %s683_s12   ;;  %s520_s11 = sphi %s555_s11, %s682_s11   ;;  %s516_s10 = sphi %s553_s10, %s681_s10   ;;  %s512_s9 = sphi %s551_s9, %s680_s9  }
   0x6   : > { %p581_p1 = scmp.eq.s32.totalorder %s339_s15, 0  ;;  %p341_p2 = scmp.ge.s32.totalorder %s532_s14, 1 }
   0x7   : > { %p115_p3 = scmp.lt.s32.totalorder %s532_s14, 3  ;;  %s534_s19 = smov [#allocation4]  }
   0x8   : > { %p589_p4 = por %p581_p1, %p50_p0  ;;  %s131_s20 = sshll.u32 %s534_s19, 4  ;;  %s132_s20 = int_to_ptr.vmem [resolvable:$true] %s131_s20 }
   0x9   : > { %p593_p5 = pnand %p341_p2, %p115_p3  ;;  %s28_s22 = sadd.s32 1, %s528_s13 }
   0xa   : > { %s37_s23 = sadd.s32 1, %s520_s11  ;;  %p30_p8 = scmp.ge.s32.totalorder %s28_s22, 2 }
   0xb   : > { %p363_p6 = pneg %p593_p5  ;;  %s435_s24 = scalar_lea.vmem %s132_s20, 64 }
   0xc   : > { %p436_p10 = scmp.ne.s32.totalorder %s132_s20, %s435_s24  ;;  %p443_p13 = scmp.lt.s32.totalorder %s132_s20, %s132_s20 }
   0xd   : > { %p601_p7 = pnand %p363_p6, %p581_p1  ;;  %p444_p0 = scmp.lt.s32.totalorder %s435_s24, %s435_s24 }
   0xf   : > { %p426_p9 = pneg %p601_p7  ;;  %p445_p2 = por %p444_p0, %p443_p13 }
  0x11   : > { %p438_p11 = pnand %p436_p10, %p426_p9 }
  0x13   : > { %p439_p12 = pneg %p438_p11 }
  0x15   : > { %p446_p3 = pnand %p445_p2, %p439_p12 }
  0x17   : > { %449 = shalt.err (!%p446_p3)
}
  0x18   : > { %366 = dma.hbm_to_vmem [thread:$0]  (!%p601_p7), %s673_s1, 64, %s132_s20, [#allocation5]  }
  0x19   : > { %s686_s22 = smov (%p30_p8, %s28_s22), 0  ;;  %p44_p6 = scmp.ne.s32.totalorder %s520_s11, %s516_s10 }
  0x1a   : > { %p45_p9 = scmp.eq.s32.totalorder %s532_s14, 0  ;;  %s32_s27 = ssub.s32 %s528_s13, %s686_s22 }
  0x1b   : > { %p372_p10 = scmp.lt.s32.totalorder %s532_s14, 2  ;;  %p35_p11 = scmp.eq.s32.totalorder %s32_s27, 0 }
  0x1c   : > { %p46_p12 = por %p45_p9, %p44_p6  ;;  %s142_s28 = sand.u32 1, %s520_s11  }
  0x1d   : > { %s355_s29 = sshll.u32 %s528_s13, 7  ;;  %s344_s3 = sshll.u32 %s142_s28, 3 }
  0x1e   : > { %s625_s30 = scalar_select %p35_p11, %s520_s11, %s37_s23  }
  0x1f   : > { %s154_s6 = scalar_lea.hbm %s672_s0, %s355_s29  ;;  %s146_s7 = scalar_lea.vmem [#allocation2], %s344_s3 }
  0x20   : > { %s156_s8 = sshll.u32 %s146_s7, 4  ;;  %p630_p7 = pnand %p372_p10, %p46_p12  ;;  %s157_s8 = int_to_ptr.vmem [resolvable:$true] %s156_s8 }
  0x21   : > { %s143_s15 = scalar_lea.sflag [#allocation3], %s142_s28  ;;  %s463_s19 = scalar_lea.vmem %s157_s8, 128 }
  0x22   : > { %p452_p8 = pneg %p630_p7  ;;  %p464_p13 = scmp.ne.s32.totalorder %s157_s8, %s463_s19 }
  0x23   : > { %s535_s20 = smov [#allocation2]  }
  0x24   : > { %p466_p0 = pnand %p464_p13, %p452_p8  ;;  %s468_s21 = sshll.u32 %s535_s20, 4  ;;  %s469_s21 = int_to_ptr.vmem [resolvable:$false] %s468_s21 }
  0x25   : > { %s470_s23 = scalar_lea.vmem %s469_s21, 256  ;;  %p471_p3 = scmp.lt.s32.totalorder %s157_s8, %s469_s21 }
  0x26   : > { %p467_p2 = pneg %p466_p0  ;;  %p472_p6 = scmp.lt.s32.totalorder %s470_s23, %s463_s19 }
  0x28   : > { %p473_p9 = por %p472_p6, %p471_p3 }
  0x2a   : > { %p474_p10 = pnand %p473_p9, %p467_p2 }
  0x2c   : > { %477 = shalt.err (!%p474_p10)
}
  0x2d   : > { %370 = dma.hbm_to_vmem [thread:$0]  (!%p630_p7), %s154_s6, 128, %s157_s8, %s143_s15  }
  0x2e   : > { %165 = sbr.rel (%p593_p5) target bundleno = 61 (0x3d), region = 28  ;;  %s167_s24 = sand.u32 (!%p593_p5), 1, %s516_s10  }
  0x2f   : > { %s348_s25 = sshll.u32 (!%p593_p5), %s167_s24, 3  ;;  %s168_s26 = scalar_lea.sflag (!%p593_p5), [#allocation3], %s167_s24 }
  0x30   : > { %s171_s27 = scalar_lea.vmem (!%p593_p5), [#allocation2], %s348_s25 }
  0x33   : > { %503 = dma.done.wait (%p589_p4), %s168_s26, 128  }
  0x34   : > { %505 = vsyncadd (%p589_p4), %s168_s26, 4294967168 }
  0x35   : > { %507 = dma.done.wait (%p581_p1), [#allocation5], 64  }
  0x36   : > { %509 = vsyncadd (%p581_p1), [#allocation5], 4294967232  ;;  %p203_p5 = scmp.lt.s32.totalorder %s524_s12, 1  ;;  %v212_v0 = vld [vmem:[%s171_s27] sm:$0xff] }
  0x37   : > { %v352_v1 = vld.sshfl [vmem:[#allocation4] sm:$0x33 pattern:$0x76325410]  ;;  %v214_v2 = vcombine.high %v212_v0, %v212_v0 }
  0x38   : > { %s688_s12 = smov (!%p203_p5, %s524_s12), 1  ;;  %v227_v3 = vcombine.low %v352_v1, %v352_v1 }
  0x39   : > { %s356_s18 = sshll.u32 %s688_s12, 4 }
  0x3a   : > { %s210_s3 = scalar_lea.vmem %s674_s2, %s356_s18 }
  0x3b   : > { %216 = vst [vmem:[%s210_s3] sm:$0xf] %v212_v0  ;;  %231 = vst [vmem:[%s210_s3 + $0x8] sm:$0x30] %v352_v1 }
  0x3c   : > { %217 = vst [vmem:[%s210_s3 + $0x8] sm:$0xf] %v214_v2  ;;  %230 = vst [vmem:[%s210_s3] sm:$0x30] %v227_v3 }
  0x3d PF: > { %s16_s14 = sadd.s32 1, %s532_s14   ;;  %s680_s9 = smov %s516_s10 }
  0x3e   : > { %p13_p1 = scmp.ge.s32.totalorder %s16_s14, 4   ;;  %s681_s10 = smov %s520_s11 }
  0x3f   : > { %s682_s11 = smov %s625_s30  ;;  %s683_s12 = smov %s528_s13 }
  0x40   : > { %s684_s13 = smov %s686_s22  ;;  %15 = sbr.rel (!%p13_p1) target bundleno = 5 (0x5), region = 73 }
  0x45   :  { %262 = vsyncpa [#allocation3], 1 }
  0x46   :  { %264 = vsyncpa [#allocation3 + $0x1], 1 }
  0x47   :  { %265 = vsyncpa [#allocation5], 1 }

</bundles_post_ra>
